<compile_context>
chip_gen: v6e
topology: v6e:2x2x1
jax: 0.10.0
libtpu: 0.0.40
codegen_flags: <defaults>
</compile_context>

<pallas_src>
import jax
import jax.numpy as jnp
from jax.experimental import pallas as pl
from jax.experimental.pallas import tpu as pltpu


def _pick_rows_per_block(n_rows, batch, max_tokens=128):
    """Pick how many patch-rows of one image go into a grid step.

    Constraints: `rows` divides N; the input block's token dim (rows*N) is a
    multiple of 8 (sublane rule) or the full N*N; rows*N <= max_tokens so the
    spread matmuls / one-hot spread stay small; and (on v7x) the parallel grid
    keeps >= 2 steps so the second TensorCore is not idle."""
    cands = [r for r in range(1, n_rows + 1)
             if n_rows % r == 0 and ((r * n_rows) % 8 == 0 or r == n_rows)]
    fitting = [r for r in cands if r * n_rows <= max_tokens]
    rows = max(fitting) if fitting else min(cands)
    if batch * (n_rows // rows) < 2:  # keep >= 2 parallel grid steps (v7x megacore)
        smaller = [r for r in fitting if n_rows // r >= 2] or \
                  [r for r in cands if n_rows // r >= 2]
        if smaller:
            rows = max(smaller)
    return rows


def _make_unpatch_kernel(rows, N, p, embed_dim):
    A = embed_dim * p          # projection rows per v, ordered (o, u)
    Wout = N * p               # full output image width
    L = rows * Wout            # accumulator lane width: (r, j*p+v)

    def kernel(x_ref, w_ref, s_ref, b_ref, o_ref):
        # x_ref : (1, rows*N, E)        bf16 tokens of `rows` patch-rows of one image
        # w_ref : (p*A, E)              bf16, w_ref[v*A + o*p+u, c] = weight[c, o, u, v]
        # s_ref : (p, rows*N, L)        bf16 one-hot: s[v, r*N+j, r*Wout + j*p+v] = 1
        # b_ref : (A, 1)                f32,  b[o*p+u] = bias[o]
        # o_ref : (1, embed_dim, rows, p, Wout)
        #
        # 1) ONE projection matmul over the whole block (MXU, f32 accumulate).
        p_all = jax.lax.dot_general(
            w_ref[...], x_ref[0],
            dimension_numbers=(((1,), (1,)), ((), ())),
            preferred_element_type=jnp.float32)              # (p*A, rows*N)
        p_bf = p_all.astype(jnp.bfloat16)                    # exact-permutation spread below

        # 2) Pixel-shuffle spread: p permutation matmuls, contraction depth rows*N.
        #    acc[(o,u), r*Wout + j*p+v] = P[(v,o,u), r*N+j] + bias[o]
        acc = jnp.broadcast_to(b_ref[...], (A, L))           # bias-seeded, hoisted once
        for v in range(p):                                   # p is small: unrolled
            acc = acc + jnp.dot(p_bf[v * A:(v + 1) * A, :], s_ref[v],
                                preferred_element_type=jnp.float32)

        # 3) One dense store per output patch-row, all embed_dim channels at once.
        #    (acc sublane dim A splits into (embed_dim, p) for free; lane dim is the
        #    full image width.  At demo sizes Wout=32 < 128 lanes so stores are lane-
        #    masked; for real crossvit widths (>=128) the masked tail is minor.)
        # TODO(synk): for very large `rows`, switch this static loop to lax.fori_loop.
        for r in range(rows):
            o_ref[0, :, r, :, :] = (
                acc[:, r * Wout:(r + 1) * Wout]
                .reshape(embed_dim, p, Wout)
                .astype(o_ref.dtype))

    return kernel


def unpatch_embed_forward(x, weight, bias, img_size, patch_size, embed_dim):
    """
    x:      (B, N*N, E)            float32
    weight: (E, embed_dim, p, p)   float32  (ConvTranspose2d layout: in, out, kH, kW)
    bias:   (embed_dim,)           float32
    returns (B, embed_dim, N*p, N*p)
    """
    B, NN, E = x.shape
    N = int(round(NN ** 0.5))
    assert N * N == NN, f"token count {NN} is not a perfect square"
    assert N == img_size, f"Input image size ({N}) doesn't match model ({img_size})."
    p = patch_size
    A = embed_dim * p
    Wout = N * p

    rows = _pick_rows_per_block(N, B)
    T = rows * N                 # tokens per grid step
    L = rows * Wout              # accumulator / spread lane width

    # --- parameter re-layout (tiny; hoist to model init or let jit constant-fold) ---
    # w_all[v*A + o*p + u, c] = weight[c, o, u, v]; bf16 operands, f32 accumulation.
    w_all = jnp.transpose(weight, (3, 1, 2, 0)).reshape(p * A, E).astype(jnp.bfloat16)
    b2 = jnp.repeat(bias.astype(jnp.float32), p).reshape(A, 1)          # [(o,u)] -> bias[o]
    tok = jnp.arange(T)
    cols = (tok // N) * Wout + (tok % N) * p                            # r*Wout + j*p
    spread = jax.nn.one_hot(cols[None, :] + jnp.arange(p)[:, None], L,
                            dtype=jnp.bfloat16)                         # (p, T, L)
    x_bf = x.astype(jnp.bfloat16)

    grid = (B, N // rows)
    kernel = _make_unpatch_kernel(rows, N, p, embed_dim)

    out5 = pl.pallas_call(
        kernel,
        out_shape=jax.ShapeDtypeStruct((B, embed_dim, N, p, Wout), x.dtype),
        grid_spec=pltpu.PrefetchScalarGridSpec(
            num_scalar_prefetch=0,
            grid=grid,
            in_specs=[
                pl.BlockSpec((1, T, E), lambda b, t: (b, t, 0)),
                pl.BlockSpec((p * A, E), lambda b, t: (0, 0)),
                pl.BlockSpec((p, T, L), lambda b, t: (0, 0, 0)),
                pl.BlockSpec((A, 1), lambda b, t: (0, 0)),
            ],
            out_specs=pl.BlockSpec((1, embed_dim, rows, p, Wout),
                                   lambda b, t: (b, 0, t, 0, 0)),
        ),
        compiler_params=pltpu.CompilerParams(
            dimension_semantics=("parallel", "parallel"),
            # Within v7x's 64 MiB physical VMEM; can grow on v5e/v6e (128 MiB) if
            # max_tokens / blocks are enlarged.
            vmem_limit_bytes=48 * 1024 * 1024),
    )(x_bf, w_all, spread, b2)

    # Free (memory-order-preserving) reshape to NCHW: [b][o][i][u][(j,v)] == [b][o][h][w].
    return out5.reshape(B, embed_dim, Wout, Wout)


if __name__ == "__main__":
    # Small shapes: img_size (N) = 8, patch_size = 4, in_chans = 32, embed_dim = 8.
    B, N, P, E, EMBED = 2, 8, 4, 32, 8

    key = jax.random.PRNGKey(0)
    kx, kw, kb = jax.random.split(key, 3)
    x = jax.random.normal(kx, (B, N * N, E), dtype=jnp.float32)
    weight = jax.random.normal(kw, (E, EMBED, P, P), dtype=jnp.float32) * 0.02
    bias = jax.random.normal(kb, (EMBED,), dtype=jnp.float32) * 0.02

    fwd = jax.jit(unpatch_embed_forward,
                  static_argnames=("img_size", "patch_size", "embed_dim"))
    out = jax.block_until_ready(
        fwd(x, weight, bias, img_size=N, patch_size=P, embed_dim=EMBED))
    assert out.shape == (B, EMBED, N * P, N * P), out.shape

    # Pure-JAX reference of the stride==kernel ConvTranspose2d, with the same bf16
    # operand rounding the kernel applies on the MXU (accumulation stays f32).
    xb = x.astype(jnp.bfloat16).astype(jnp.float32)
    wb = weight.astype(jnp.bfloat16).astype(jnp.float32)
    x6 = xb.reshape(B, N, N, E)
    ref = jnp.einsum("bije,eouv->boiujv", x6, wb) + bias[None, :, None, None, None, None]
    ref = ref.reshape(B, EMBED, N * P, N * P)
    max_err = float(jnp.max(jnp.abs(out - ref)))
    assert jnp.allclose(out, ref, atol=1e-2, rtol=1e-2), max_err

    print("KERNEL_OK")
</pallas_src>

<mosaic_0001>
module attributes {stable_mosaic.version = 11 : i64} {
  func.func @kernel(%arg0: i32, %arg1: i32, %arg2: memref<1x64x32xbf16, #tpu.memory_space<vmem>>, %arg3: memref<128x32xbf16, #tpu.memory_space<vmem>>, %arg4: memref<4x64x256xbf16, #tpu.memory_space<vmem>>, %arg5: memref<32x1xf32, #tpu.memory_space<vmem>>, %arg6: memref<1x8x8x4x32xf32, #tpu.memory_space<vmem>>) attributes {dimension_semantics = [#tpu.dimension_semantics<parallel>, #tpu.dimension_semantics<parallel>], iteration_bounds = array<i64: 2, 1>, scalar_prefetch = 0 : i64, scratch_operands = 0 : i64, tpu.core_type = #tpu.core_type<tc>, window_params = [{transform_indices = @transform_0, window_bounds = array<i64: 1, 64, 32>}, {pipeline_mode = #tpu.pipeline_mode<synchronous>, transform_indices = @transform_1, window_bounds = array<i64: 128, 32>}, {pipeline_mode = #tpu.pipeline_mode<synchronous>, transform_indices = @transform_2, window_bounds = array<i64: 4, 64, 256>}, {pipeline_mode = #tpu.pipeline_mode<synchronous>, transform_indices = @transform_3, window_bounds = array<i64: 32, 1>}, {transform_indices = @transform_4, window_bounds = array<i64: 1, 8, 8, 4, 32>}]} {
    %c0 = arith.constant 0 : index
    %c0_0 = arith.constant 0 : index
    %0 = vector.load %arg3[%c0, %c0_0] : memref<128x32xbf16, #tpu.memory_space<vmem>>, vector<128x32xbf16>
    %c0_1 = arith.constant 0 : index
    %c0_2 = arith.constant 0 : index
    %c0_3 = arith.constant 0 : index
    %1 = vector.load %arg2[%c0_1, %c0_2, %c0_3] : memref<1x64x32xbf16, #tpu.memory_space<vmem>>, vector<1x64x32xbf16>
    %2 = vector.shape_cast %1 : vector<1x64x32xbf16> to vector<64x32xbf16>
    %cst = arith.constant dense<0.000000e+00> : vector<128x64xf32>
    %3 = tpu.matmul %0, %2, %cst {dimension_numbers = #tpu.dot_dimension_numbers<[1], [1], [0], [0], [0, 0, 1, 0], [], []>} : vector<128x32xbf16>, vector<64x32xbf16>, vector<128x64xf32> -> vector<128x64xf32>
    %4 = arith.truncf %3 : vector<128x64xf32> to vector<128x64xbf16>
    %c0_4 = arith.constant 0 : index
    %c0_5 = arith.constant 0 : index
    %5 = vector.load %arg5[%c0_4, %c0_5] : memref<32x1xf32, #tpu.memory_space<vmem>>, vector<32x1xf32>
    %6 = vector.shape_cast %5 : vector<32x1xf32> to vector<32x1xf32>
    %7 = vector.broadcast %6 : vector<32x1xf32> to vector<32x256xf32>
    %8 = vector.extract_strided_slice %4 {offsets = [0, 0], sizes = [32, 64], strides = [1, 1]} : vector<128x64xbf16> to vector<32x64xbf16>
    %c0_6 = arith.constant 0 : index
    %c0_7 = arith.constant 0 : index
    %c0_8 = arith.constant 0 : index
    %9 = vector.load %arg4[%c0_6, %c0_7, %c0_8] : memref<4x64x256xbf16, #tpu.memory_space<vmem>>, vector<1x64x256xbf16>
    %10 = vector.shape_cast %9 : vector<1x64x256xbf16> to vector<64x256xbf16>
    %cst_9 = arith.constant dense<0.000000e+00> : vector<32x256xf32>
    %11 = tpu.matmul %8, %10, %cst_9 {dimension_numbers = #tpu.dot_dimension_numbers<[1], [0], [0], [1], [0, 0, 1, 1], [], []>} : vector<32x64xbf16>, vector<64x256xbf16>, vector<32x256xf32> -> vector<32x256xf32>
    %12 = arith.addf %7, %11 : vector<32x256xf32>
    %13 = vector.extract_strided_slice %4 {offsets = [32, 0], sizes = [32, 64], strides = [1, 1]} : vector<128x64xbf16> to vector<32x64xbf16>
    %c1 = arith.constant 1 : index
    %c0_10 = arith.constant 0 : index
    %c0_11 = arith.constant 0 : index
    %14 = vector.load %arg4[%c1, %c0_10, %c0_11] : memref<4x64x256xbf16, #tpu.memory_space<vmem>>, vector<1x64x256xbf16>
    %15 = vector.shape_cast %14 : vector<1x64x256xbf16> to vector<64x256xbf16>
    %cst_12 = arith.constant dense<0.000000e+00> : vector<32x256xf32>
    %16 = tpu.matmul %13, %15, %cst_12 {dimension_numbers = #tpu.dot_dimension_numbers<[1], [0], [0], [1], [0, 0, 1, 1], [], []>} : vector<32x64xbf16>, vector<64x256xbf16>, vector<32x256xf32> -> vector<32x256xf32>
    %17 = arith.addf %12, %16 : vector<32x256xf32>
    %18 = vector.extract_strided_slice %4 {offsets = [64, 0], sizes = [32, 64], strides = [1, 1]} : vector<128x64xbf16> to vector<32x64xbf16>
    %c2 = arith.constant 2 : index
    %c0_13 = arith.constant 0 : index
    %c0_14 = arith.constant 0 : index
    %19 = vector.load %arg4[%c2, %c0_13, %c0_14] : memref<4x64x256xbf16, #tpu.memory_space<vmem>>, vector<1x64x256xbf16>
    %20 = vector.shape_cast %19 : vector<1x64x256xbf16> to vector<64x256xbf16>
    %cst_15 = arith.constant dense<0.000000e+00> : vector<32x256xf32>
    %21 = tpu.matmul %18, %20, %cst_15 {dimension_numbers = #tpu.dot_dimension_numbers<[1], [0], [0], [1], [0, 0, 1, 1], [], []>} : vector<32x64xbf16>, vector<64x256xbf16>, vector<32x256xf32> -> vector<32x256xf32>
    %22 = arith.addf %17, %21 : vector<32x256xf32>
    %23 = vector.extract_strided_slice %4 {offsets = [96, 0], sizes = [32, 64], strides = [1, 1]} : vector<128x64xbf16> to vector<32x64xbf16>
    %c3 = arith.constant 3 : index
    %c0_16 = arith.constant 0 : index
    %c0_17 = arith.constant 0 : index
    %24 = vector.load %arg4[%c3, %c0_16, %c0_17] : memref<4x64x256xbf16, #tpu.memory_space<vmem>>, vector<1x64x256xbf16>
    %25 = vector.shape_cast %24 : vector<1x64x256xbf16> to vector<64x256xbf16>
    %cst_18 = arith.constant dense<0.000000e+00> : vector<32x256xf32>
    %26 = tpu.matmul %23, %25, %cst_18 {dimension_numbers = #tpu.dot_dimension_numbers<[1], [0], [0], [1], [0, 0, 1, 1], [], []>} : vector<32x64xbf16>, vector<64x256xbf16>, vector<32x256xf32> -> vector<32x256xf32>
    %27 = arith.addf %22, %26 : vector<32x256xf32>
    %28 = vector.extract_strided_slice %27 {offsets = [0, 0], sizes = [32, 32], strides = [1, 1]} : vector<32x256xf32> to vector<32x32xf32>
    %29 = vector.shape_cast %28 : vector<32x32xf32> to vector<8x4x32xf32>
    %c0_19 = arith.constant 0 : index
    %c0_20 = arith.constant 0 : index
    %c0_21 = arith.constant 0 : index
    %c0_22 = arith.constant 0 : index
    %c0_23 = arith.constant 0 : index
    %30 = vector.load %arg6[%c0_19, %c0_20, %c0_21, %c0_22, %c0_23] : memref<1x8x8x4x32xf32, #tpu.memory_space<vmem>>, vector<1x8x1x4x32xf32>
    %31 = vector.shape_cast %30 : vector<1x8x1x4x32xf32> to vector<8x4x32xf32>
    %32 = vector.shape_cast %29 : vector<8x4x32xf32> to vector<1x8x1x4x32xf32>
    tpu.vector_store %arg6[%c0_19, %c0_20, %c0_21, %c0_22, %c0_23], %32 {strides = array<i32>} : memref<1x8x8x4x32xf32, #tpu.memory_space<vmem>>, vector<1x8x1x4x32xf32>,
    %33 = vector.extract_strided_slice %27 {offsets = [0, 32], sizes = [32, 32], strides = [1, 1]} : vector<32x256xf32> to vector<32x32xf32>
    %34 = vector.shape_cast %33 : vector<32x32xf32> to vector<8x4x32xf32>
    %c0_24 = arith.constant 0 : index
    %c0_25 = arith.constant 0 : index
    %c1_26 = arith.constant 1 : index
    %c0_27 = arith.constant 0 : index
    %c0_28 = arith.constant 0 : index
    %35 = vector.load %arg6[%c0_24, %c0_25, %c1_26, %c0_27, %c0_28] : memref<1x8x8x4x32xf32, #tpu.memory_space<vmem>>, vector<1x8x1x4x32xf32>
    %36 = vector.shape_cast %35 : vector<1x8x1x4x32xf32> to vector<8x4x32xf32>
    %37 = vector.shape_cast %34 : vector<8x4x32xf32> to vector<1x8x1x4x32xf32>
    tpu.vector_store %arg6[%c0_24, %c0_25, %c1_26, %c0_27, %c0_28], %37 {strides = array<i32>} : memref<1x8x8x4x32xf32, #tpu.memory_space<vmem>>, vector<1x8x1x4x32xf32>,
    %38 = vector.extract_strided_slice %27 {offsets = [0, 64], sizes = [32, 32], strides = [1, 1]} : vector<32x256xf32> to vector<32x32xf32>
    %39 = vector.shape_cast %38 : vector<32x32xf32> to vector<8x4x32xf32>
    %c0_29 = arith.constant 0 : index
    %c0_30 = arith.constant 0 : index
    %c2_31 = arith.constant 2 : index
    %c0_32 = arith.constant 0 : index
    %c0_33 = arith.constant 0 : index
    %40 = vector.load %arg6[%c0_29, %c0_30, %c2_31, %c0_32, %c0_33] : memref<1x8x8x4x32xf32, #tpu.memory_space<vmem>>, vector<1x8x1x4x32xf32>
    %41 = vector.shape_cast %40 : vector<1x8x1x4x32xf32> to vector<8x4x32xf32>
    %42 = vector.shape_cast %39 : vector<8x4x32xf32> to vector<1x8x1x4x32xf32>
    tpu.vector_store %arg6[%c0_29, %c0_30, %c2_31, %c0_32, %c0_33], %42 {strides = array<i32>} : memref<1x8x8x4x32xf32, #tpu.memory_space<vmem>>, vector<1x8x1x4x32xf32>,
    %43 = vector.extract_strided_slice %27 {offsets = [0, 96], sizes = [32, 32], strides = [1, 1]} : vector<32x256xf32> to vector<32x32xf32>
    %44 = vector.shape_cast %43 : vector<32x32xf32> to vector<8x4x32xf32>
    %c0_34 = arith.constant 0 : index
    %c0_35 = arith.constant 0 : index
    %c3_36 = arith.constant 3 : index
    %c0_37 = arith.constant 0 : index
    %c0_38 = arith.constant 0 : index
    %45 = vector.load %arg6[%c0_34, %c0_35, %c3_36, %c0_37, %c0_38] : memref<1x8x8x4x32xf32, #tpu.memory_space<vmem>>, vector<1x8x1x4x32xf32>
    %46 = vector.shape_cast %45 : vector<1x8x1x4x32xf32> to vector<8x4x32xf32>
    %47 = vector.shape_cast %44 : vector<8x4x32xf32> to vector<1x8x1x4x32xf32>
    tpu.vector_store %arg6[%c0_34, %c0_35, %c3_36, %c0_37, %c0_38], %47 {strides = array<i32>} : memref<1x8x8x4x32xf32, #tpu.memory_space<vmem>>, vector<1x8x1x4x32xf32>,
    %48 = vector.extract_strided_slice %27 {offsets = [0, 128], sizes = [32, 32], strides = [1, 1]} : vector<32x256xf32> to vector<32x32xf32>
    %49 = vector.shape_cast %48 : vector<32x32xf32> to vector<8x4x32xf32>
    %c0_39 = arith.constant 0 : index
    %c0_40 = arith.constant 0 : index
    %c4 = arith.constant 4 : index
    %c0_41 = arith.constant 0 : index
    %c0_42 = arith.constant 0 : index
    %50 = vector.load %arg6[%c0_39, %c0_40, %c4, %c0_41, %c0_42] : memref<1x8x8x4x32xf32, #tpu.memory_space<vmem>>, vector<1x8x1x4x32xf32>
    %51 = vector.shape_cast %50 : vector<1x8x1x4x32xf32> to vector<8x4x32xf32>
    %52 = vector.shape_cast %49 : vector<8x4x32xf32> to vector<1x8x1x4x32xf32>
    tpu.vector_store %arg6[%c0_39, %c0_40, %c4, %c0_41, %c0_42], %52 {strides = array<i32>} : memref<1x8x8x4x32xf32, #tpu.memory_space<vmem>>, vector<1x8x1x4x32xf32>,
    %53 = vector.extract_strided_slice %27 {offsets = [0, 160], sizes = [32, 32], strides = [1, 1]} : vector<32x256xf32> to vector<32x32xf32>
    %54 = vector.shape_cast %53 : vector<32x32xf32> to vector<8x4x32xf32>
    %c0_43 = arith.constant 0 : index
    %c0_44 = arith.constant 0 : index
    %c5 = arith.constant 5 : index
    %c0_45 = arith.constant 0 : index
    %c0_46 = arith.constant 0 : index
    %55 = vector.load %arg6[%c0_43, %c0_44, %c5, %c0_45, %c0_46] : memref<1x8x8x4x32xf32, #tpu.memory_space<vmem>>, vector<1x8x1x4x32xf32>
    %56 = vector.shape_cast %55 : vector<1x8x1x4x32xf32> to vector<8x4x32xf32>
    %57 = vector.shape_cast %54 : vector<8x4x32xf32> to vector<1x8x1x4x32xf32>
    tpu.vector_store %arg6[%c0_43, %c0_44, %c5, %c0_45, %c0_46], %57 {strides = array<i32>} : memref<1x8x8x4x32xf32, #tpu.memory_space<vmem>>, vector<1x8x1x4x32xf32>,
    %58 = vector.extract_strided_slice %27 {offsets = [0, 192], sizes = [32, 32], strides = [1, 1]} : vector<32x256xf32> to vector<32x32xf32>
    %59 = vector.shape_cast %58 : vector<32x32xf32> to vector<8x4x32xf32>
    %c0_47 = arith.constant 0 : index
    %c0_48 = arith.constant 0 : index
    %c6 = arith.constant 6 : index
    %c0_49 = arith.constant 0 : index
    %c0_50 = arith.constant 0 : index
    %60 = vector.load %arg6[%c0_47, %c0_48, %c6, %c0_49, %c0_50] : memref<1x8x8x4x32xf32, #tpu.memory_space<vmem>>, vector<1x8x1x4x32xf32>
    %61 = vector.shape_cast %60 : vector<1x8x1x4x32xf32> to vector<8x4x32xf32>
    %62 = vector.shape_cast %59 : vector<8x4x32xf32> to vector<1x8x1x4x32xf32>
    tpu.vector_store %arg6[%c0_47, %c0_48, %c6, %c0_49, %c0_50], %62 {strides = array<i32>} : memref<1x8x8x4x32xf32, #tpu.memory_space<vmem>>, vector<1x8x1x4x32xf32>,
    %63 = vector.extract_strided_slice %27 {offsets = [0, 224], sizes = [32, 32], strides = [1, 1]} : vector<32x256xf32> to vector<32x32xf32>
    %64 = vector.shape_cast %63 : vector<32x32xf32> to vector<8x4x32xf32>
    %c0_51 = arith.constant 0 : index
    %c0_52 = arith.constant 0 : index
    %c7 = arith.constant 7 : index
    %c0_53 = arith.constant 0 : index
    %c0_54 = arith.constant 0 : index
    %65 = vector.load %arg6[%c0_51, %c0_52, %c7, %c0_53, %c0_54] : memref<1x8x8x4x32xf32, #tpu.memory_space<vmem>>, vector<1x8x1x4x32xf32>
    %66 = vector.shape_cast %65 : vector<1x8x1x4x32xf32> to vector<8x4x32xf32>
    %67 = vector.shape_cast %64 : vector<8x4x32xf32> to vector<1x8x1x4x32xf32>
    tpu.vector_store %arg6[%c0_51, %c0_52, %c7, %c0_53, %c0_54], %67 {strides = array<i32>} : memref<1x8x8x4x32xf32, #tpu.memory_space<vmem>>, vector<1x8x1x4x32xf32>,
    return
  }
  func.func @transform_0(%arg0: i32, %arg1: i32) -> (i32, i32, i32) {
    %c0_i32 = arith.constant 0 : i32
    %c0_i32_0 = arith.constant 0 : i32
    return %arg0, %arg1, %c0_i32 : i32, i32, i32
  }
  func.func @transform_1(%arg0: i32, %arg1: i32) -> (i32, i32) {
    %c0_i32 = arith.constant 0 : i32
    %c0_i32_0 = arith.constant 0 : i32
    %c0_i32_1 = arith.constant 0 : i32
    return %c0_i32, %c0_i32_0 : i32, i32
  }
  func.func @transform_2(%arg0: i32, %arg1: i32) -> (i32, i32, i32) {
    %c0_i32 = arith.constant 0 : i32
    %c0_i32_0 = arith.constant 0 : i32
    %c0_i32_1 = arith.constant 0 : i32
    %c0_i32_2 = arith.constant 0 : i32
    return %c0_i32, %c0_i32_0, %c0_i32_1 : i32, i32, i32
  }
  func.func @transform_3(%arg0: i32, %arg1: i32) -> (i32, i32) {
    %c0_i32 = arith.constant 0 : i32
    %c0_i32_0 = arith.constant 0 : i32
    %c0_i32_1 = arith.constant 0 : i32
    return %c0_i32, %c0_i32_0 : i32, i32
  }
  func.func @transform_4(%arg0: i32, %arg1: i32) -> (i32, i32, i32, i32, i32) {
    %c0_i32 = arith.constant 0 : i32
    %c0_i32_0 = arith.constant 0 : i32
    %c0_i32_1 = arith.constant 0 : i32
    %c0_i32_2 = arith.constant 0 : i32
    return %arg0, %c0_i32, %arg1, %c0_i32_0, %c0_i32_1 : i32, i32, i32, i32, i32
  }
}

</mosaic_0001>

<bundles_post_ra>
// kernel: unpatch_embed_forward.1
= control target key start
LH: loop header
LB: loop body
LE: loop exit
PB: predicated region body
PF: predicated region fallthrough
CT: control target
= control target key end

     0   :  { %9 = vsyncpa [#allocation3], 0  ;;  %s2247_s0 = inlined_call_operand.vmem [shape: bf16[2,64,32], index: 0, kind: input, shape index: {}]   ;;  %s2248_s1 = inlined_call_operand.vmem [shape: bf16[128,32], index: 1, kind: input, shape index: {}]   ;;  %s2249_s2 = inlined_call_operand.vmem [shape: bf16[4,64,256], index: 2, kind: input, shape index: {}]   ;;  %s2250_s3 = inlined_call_operand.vmem [shape: f32[32,1], index: 3, kind: input, shape index: {}]   ;;  %s2251_s4 = inlined_call_operand.hbm [shape: f32[2,8,8,4,32], index: 4, kind: output, shape index: {}]  }
   0x1   :  { %11 = vsyncpa [#allocation3 + $0x1], 0  ;;  %s1711_s15 = smov 0   ;;  %s1713_s16 = smov 0  }
   0x2   :  { %s1715_s17 = smov 0   ;;  %s1717_s18 = smov 0  }
   0x3   :  { %s1719_s19 = smov 0   ;;  %s1721_s20 = smov 0  }
   0x4 LB: > { %s1277_s21 = sadd.s32 4294967295, %s1678_s20   ;;  %s1278_s22 = sadd.s32 4294967294, %s1678_s20   ;;  %s1678_s20 = sphi %s1721_s20, %s17_s20   ;;  %s1674_s19 = sphi %s1719_s19, %s2258_s19   ;;  %s1670_s18 = sphi %s1717_s18, %s2257_s18   ;;  %s1666_s17 = sphi %s1715_s17, %s2256_s17   ;;  %s1662_s16 = sphi %s1713_s16, %s2255_s16   ;;  %s1658_s15 = sphi %s1711_s15, %s2254_s15  }
   0x5   : > { %s29_s23 = sadd.s32 1, %s1674_s19  ;;  %s129_s24 = sadd.s32 1, %s1666_s17 }
   0x6   : > { %p31_p0 = scmp.ge.s32.totalorder %s29_s23, 2  ;;  %p139_p1 = scmp.ne.s32.totalorder %s1666_s17, %s1662_s16 }
   0x7   : > { %p140_p2 = scmp.eq.s32.totalorder %s1277_s21, 1  ;;  %p145_p3 = scmp.ne.s32.totalorder %s1662_s16, %s1658_s15 }
   0x8   : > { %s2260_s23 = smov (%p31_p0, %s29_s23), 0  ;;  %p146_p5 = scmp.eq.s32.totalorder %s1278_s22, 1 }
   0x9   : > { %p1751_p4 = por %p140_p2, %p139_p1  ;;  %s124_s26 = ssub.s32 %s1674_s19, %s2260_s23 }
   0xa   : > { %p1281_p6 = scmp.ge.s32.totalorder %s1678_s20, 1  ;;  %p127_p7 = scmp.eq.s32.totalorder %s124_s26, 0 }
   0xb   : > { %p1758_p8 = por %p146_p5, %p145_p3  ;;  %p186_p9 = scmp.lt.s32.totalorder %s1678_s20, 3 }
   0xc   : > { %s1764_s28 = scalar_select %p127_p7, %s1666_s17, %s129_s24  }
   0xd   : > { %p187_p10 = pnand %p1281_p6, %p186_p9 }
   0xe   : > { %p217_p11 = scmp.lt.s32.totalorder (!%p187_p10), %s1670_s18, 1  ;;  %s213_s22 = sand.u32 (!%p187_p10), 1, %s1662_s16  }
   0xf   : > { %190 = sbr.rel (%p187_p10) target bundleno = 710 (0x2c6), region = 36  ;;  %s1282_s24 = sshll.u32 (!%p187_p10), %s213_s22, 8 }
  0x10   : > { %s1982_s26 = scalar_lea.vmem (!%p187_p10), [#allocation2], %s1282_s24  ;;  %s1681_s29 = smov (!%p187_p10), 96  }
  0x11   : > { %s1682_s30 = smov (!%p187_p10), 64   ;;  %s1198_s7 = sshll.u32 (!%p187_p10), %s1982_s26, 4  ;;  %s2194_s7 = int_to_ptr.vmem [resolvable:$true] %s1198_s7 }
  0x12   : > { %s1602_s11 = scalar_lea.vmem (!%p187_p10), %s2194_s7, 4096  ;;  %s1684_s12 = smov (!%p187_p10), [#allocation2]  }
  0x13   : > { %p1603_p12 = scmp.ne.s32.totalorder (!%p187_p10), %s2194_s7, %s1602_s11  ;;  %s1606_s13 = sshll.u32 (!%p187_p10), %s1684_s12, 4  ;;  %s1607_s13 = int_to_ptr.vmem [resolvable:$false] %s1606_s13 }
  0x14   : > { %v1546_v0 = vld [vmem:[%s2248_s1] sm:$0xff]   ;;  %s218_s5 = scalar_select %p217_p11, %s1670_s18, 1  ;;  %vm312_vm0 = vcmask 261120   ;;  %v1554_v5 = vld [vmem:[%s2249_s2 + $0x34] ss:$8 sps:$4 sm:$0xff]   ;;  %v1547_v13 = vld [vmem:[%s2248_s1 + $0x8] sm:$0xff]  }
  0x15   : > { %1452 = vmatprep.mubr.msk.bf16.mxu0 %vm312_vm0, %v1546_v0  ;;  %v1556_v6 = vld [vmem:[%s2249_s2 + $0x30] ss:$8 sps:$4 sm:$0xff]   ;;  %v1557_v8 = vld [vmem:[%s2249_s2 + $0x24] ss:$8 sps:$4 sm:$0xff]   ;;  %v1559_v9 = vld [vmem:[%s2249_s2 + $0x20] ss:$8 sps:$4 sm:$0xff]   ;;  %541 = vmatprep.subr.bf16.mxu1 %v1554_v5  ;;  %p1604_p13 = pnand %p1603_p12, %p1751_p4  ;;  %p1609_p1 = scmp.lt.s32.totalorder %s2194_s7, %s1607_s13 }
  0x16   : > { %s1430_s6 = sshll.u32 %s218_s5, 5  ;;  %542 = vmatpush1.bf16.msra.mxu1 %v1556_v6  ;;  %v1548_v14 = vld [vmem:[%s2248_s1 + $0x10] sm:$0xff]   ;;  %v1549_v15 = vld [vmem:[%s2248_s1 + $0x18] sm:$0xff]   ;;  %v1550_v16 = vld [vmem:[%s2248_s1 + $0x20] sm:$0xff]   ;;  %v1680_v25 = vmov 0   ;;  %vm526_vm1 = vcmask 523264  }
  0x17   : > { %s224_s9 = scalar_lea.vmem %s2247_s0, %s1430_s6  ;;  %543 = vmatprep.subr.bf16.mxu1 %v1557_v8  ;;  %v1551_v17 = vld [vmem:[%s2248_s1 + $0x28] sm:$0xff]   ;;  %v1552_v18 = vld [vmem:[%s2248_s1 + $0x30] sm:$0xff]   ;;  %v1553_v19 = vld [vmem:[%s2248_s1 + $0x38] sm:$0xff]   ;;  %565 = vmatprep.mubr.bf16.mxu1 %v1680_v25  ;;  %vm954_vm2 = vcmask 257024   ;;  %s1683_s5 = smov 32  }
  0x18   : > { %v1542_v1 = vld [vmem:[%s224_s9 + $0x18] sm:$0xff]   ;;  %v1543_v2 = vld [vmem:[%s224_s9 + $0x10] sm:$0xff]   ;;  %v1544_v4 = vld [vmem:[%s224_s9 + $0x8] sm:$0xff]   ;;  %1540 = vset.pattern.permute.xlu0 %v1680_v25  ;;  %1541 = vset.pattern.permute.xlu1 %v1680_v25  ;;  %s1431_s6 = sshll.u32 %s1670_s18, 12  ;;  %s2200_s18 = scalar_lea.sflag [#allocation3], %s213_s22 }
  0x19   : > { %1476 = vmatprep.subr.msk.bf16.mxu0 %vm312_vm0, %v1542_v1  ;;  %v347_v3 = vsel %vm312_vm0, %v1542_v1, 0  ;;  %v344_v7 = vsel %vm312_vm0, %v1543_v2, 0  ;;  %v1545_v10 = vld [vmem:[%s224_s9] sm:$0xff]   ;;  %v341_v11 = vsel %vm312_vm0, %v1544_v4, 0  ;;  %v1560_v20 = vld [vmem:[%s2249_s2 + $0x14] ss:$8 sps:$4 sm:$0xff]   ;;  %s2190_s10 = scalar_lea.hbm %s2251_s4, %s1431_s6  ;;  %p1605_p0 = pneg %p1604_p13 }
  0x1a   : > { %1445 = vmatpush3.bf16.xpose.msra.mxu0 %v347_v3  ;;  %544 = vmatpush1.bf16.msra.mxu1 %v1559_v9  ;;  %v338_v12 = vsel %vm312_vm0, %v1545_v10, 0  ;;  %v1562_v21 = vld [vmem:[%s2249_s2 + $0x10] ss:$8 sps:$4 sm:$0xff]   ;;  %v1563_v22 = vld [vmem:[%s2249_s2 + $0x4] ss:$8 sps:$4 sm:$0xff]   ;;  %s1608_s14 = scalar_lea.vmem %s1607_s13, 8192 }
  0x1b   : > { %1477 = vmatprep.subr.msk.bf16.mxu0 %vm312_vm0, %v1543_v2  ;;  %545 = vmatprep.subr.bf16.mxu1 %v1560_v20  ;;  %v1565_v23 = vld [vmem:[%s2249_s2] ss:$8 sps:$4 sm:$0xff]   ;;  %v1568_v24 = vld [vmem:[%s2249_s2 + $0x74] ss:$8 sps:$4 sm:$0xff]   ;;  %v1844_v26 = vld [vmem:[%s2249_s2 + $0xf0] ss:$8 sps:$4 sm:$0xff]   ;;  %p1610_p2 = scmp.lt.s32.totalorder %s1608_s14, %s1602_s11 }
  0x1c   : > { %v1849_v27 = vld [vmem:[%s2249_s2 + $0xf4] ss:$8 sps:$4 sm:$0xff]   ;;  %v1857_v28 = vld [vmem:[%s2249_s2 + $0xe0] ss:$8 sps:$4 sm:$0xff]   ;;  %v1862_v29 = vld [vmem:[%s2249_s2 + $0xe4] ss:$8 sps:$4 sm:$0xff]  }
  0x1d   : > { %v1869_v30 = vld [vmem:[%s2249_s2 + $0xd4] ss:$8 sps:$4 sm:$0xff]   ;;  %v1874_v31 = vld [vmem:[%s2249_s2 + $0xd0] ss:$8 sps:$4 sm:$0xff]   ;;  %v1881_v32 = vld [vmem:[%s2249_s2 + $0xc4] ss:$8 sps:$4 sm:$0xff]   ;;  %p1611_p3 = por %p1610_p2, %p1609_p1 }
  0x1e   : > { %546 = vmatpush1.bf16.msra.mxu1 %v1562_v21  ;;  %v1886_v33 = vld [vmem:[%s2249_s2 + $0xc0] ss:$8 sps:$4 sm:$0xff]   ;;  %v456_v35 = vld [vmem:[%s2250_s3 + $0x10] sm:$0xff]  ;;  %v457_v37 = vld [vmem:[%s2250_s3 + $0x18] sm:$0xff] }
  0x1f   : > { %547 = vmatprep.subr.bf16.mxu1 %v1563_v22  ;;  %v454_v34 = vld [vmem:[%s2250_s3] sm:$0xff]  ;;  %470 = vperm.xlu1 %1541, %v456_v35   ;;  %v455_v36 = vld [vmem:[%s2250_s3 + $0x8] sm:$0xff]  ;;  %v1566_v42 = vld [vmem:[%s2249_s2 + $0x70] ss:$8 sps:$4 sm:$0xff]   ;;  %p1612_p5 = pnand %p1611_p3, %p1605_p0 }
  0x20   : > { %460 = vperm.xlu0 %1540, %v454_v34   ;;  %v1574_v44 = vld [vmem:[%s2249_s2 + $0x64] ss:$8 sps:$4 sm:$0xff]   ;;  %v1572_v47 = vld [vmem:[%s2249_s2 + $0x60] ss:$8 sps:$4 sm:$0xff]   ;;  %v1577_v48 = vld [vmem:[%s2249_s2 + $0x54] ss:$8 sps:$4 sm:$0xff]  }
  0x21   : > { %v1575_v51 = vld [vmem:[%s2249_s2 + $0x50] ss:$8 sps:$4 sm:$0xff]   ;;  %v1583_v53 = vld [vmem:[%s2249_s2 + $0x44] ss:$8 sps:$4 sm:$0xff]   ;;  %v1581_v56 = vld [vmem:[%s2249_s2 + $0x40] ss:$8 sps:$4 sm:$0xff]  }
  0x22   : > { %1447 = vmatpush3.bf16.xpose.msra.mxu0 %v344_v7  ;;  %548 = vmatpush1.bf16.msra.mxu1 %v1565_v23  ;;  %v1586_v57 = vld [vmem:[%s2249_s2 + $0xb4] ss:$8 sps:$4 sm:$0xff]   ;;  %v1584_v60 = vld [vmem:[%s2249_s2 + $0xb0] ss:$8 sps:$4 sm:$0xff]   ;;  %v1592_v62 = vld [vmem:[%s2249_s2 + $0xa4] ss:$8 sps:$4 sm:$0xff]  }
  0x23   : > { %1478 = vmatprep.subr.msk.bf16.mxu0 %vm312_vm0, %v1544_v4  ;;  %657 = vmatprep.subr.bf16.mxu1 %v1568_v24  ;;  %v1590_v1 = vld [vmem:[%s2249_s2 + $0xa0] ss:$8 sps:$4 sm:$0xff]   ;;  %v1598_v2 = vld [vmem:[%s2249_s2 + $0x94] ss:$8 sps:$4 sm:$0xff]   ;;  %v1596_v5 = vld [vmem:[%s2249_s2 + $0x90] ss:$8 sps:$4 sm:$0xff]  }
  0x24   : > { %465 = vperm.xlu0 %1540, %v455_v36   ;;  %475 = vperm.xlu1 %1541, %v457_v37   ;;  %v1601_v8 = vld [vmem:[%s2249_s2 + $0x84] ss:$8 sps:$4 sm:$0xff]   ;;  %v1599_v9 = vld [vmem:[%s2249_s2 + $0x80] ss:$8 sps:$4 sm:$0xff]  }
  0x2a   : > { %1449 = vmatpush3.bf16.xpose.msra.mxu0 %v341_v11 }
  0x2b   : > { %1479 = vmatprep.subr.msk.bf16.mxu0 %vm312_vm0, %v1545_v10 }
  0x32   : > { %1451 = vmatpush3.bf16.xpose.msra.mxu0 %v338_v12 }
  0x33   : > { %889 = vmatprep.subr.bf16.mxu0 %v1849_v27 }
  0x39   : > { %1453 = vmatmul.mubr.msk.bf16.vlgmr.msra.gmra.mxu0 %vm312_vm0, %v1547_v13 }
  0x3a   : > { %1456 = vmatprep.mubr.msk.bf16.mxu0 %vm312_vm0, %v1548_v14  ;;  %890 = vmatpush1.bf16.msra.mxu0 %v1844_v26 }
  0x3b   : > { %891 = vmatprep.subr.bf16.mxu0 %v1862_v29 }
  0x3e   : > { %892 = vmatpush1.bf16.msra.mxu0 %v1857_v28 }
  0x3f   : > { %893 = vmatprep.subr.bf16.mxu0 %v1869_v30 }
  0x41   : > { %1457 = vmatmul.mubr.msk.bf16.gmra.mxu0 %vm312_vm0, %v1549_v15 }
  0x42   : > { %1460 = vmatprep.mubr.msk.bf16.mxu0 %vm312_vm0, %v1550_v16  ;;  %894 = vmatpush1.bf16.msra.mxu0 %v1874_v31 }
  0x43   : > { %895 = vmatprep.subr.bf16.mxu0 %v1881_v32 }
  0x46   : > { %896 = vmatpush1.bf16.msra.mxu0 %v1886_v33 }
  0x49   : > { %1461 = vmatmul.mubr.msk.bf16.gmra.mxu0 %vm312_vm0, %v1551_v17 }
  0x4a   : > { %1464 = vmatprep.mubr.msk.bf16.mxu0 %vm312_vm0, %v1552_v18 }
  0x51   : > { %1465 = vmatmul.mubr.msk.bf16.gmra.mxu0 %vm312_vm0, %v1553_v19 }
  0x52   : > { %913 = vmatprep.mubr.bf16.mxu0 %v1680_v25 }
  0xf9   : > { %v1454_v38 = vpop.f32.mrf.mxu0 }
  0xfb   : > { %v383_v39 = vpop.f32.mrf.mxu0 }
  0xfd   : > { %v1455_v40 = vpop.f32.mrf.mxu0 }
  0xfe   : > { %v447_v52 = vpack.c.bf16 %v1455_v40, %v1454_v38 }
  0xff   : > { %v386_v41 = vpop.f32.mrf.mxu0 }
 0x100   : > { %v446_v43 = vpack.c.bf16 %v386_v41, %v383_v39 }
 0x101   : > { %v1458_v45 = vpop.f32.mrf.mxu0 }
 0x102   : > { %1313 = vmatmul.mubr.msk.bf16.vlgmr.msra.gmra.mxu1 %vm526_vm1, %v446_v43 }
 0x103   : > { %658 = vmatpush1.bf16.msra.mxu1 %v1566_v42  ;;  %v399_v46 = vpop.f32.mrf.mxu0  ;;  %575 = vmatprep.mubr.bf16.mxu1 %v1680_v25 }
 0x104   : > { %659 = vmatprep.subr.bf16.mxu1 %v1574_v44 }
 0x105   : > { %v1459_v49 = vpop.f32.mrf.mxu0 }
 0x106   : > { %v449_v6 = vpack.c.bf16 %v1459_v49, %v1458_v45 }
 0x107   : > { %660 = vmatpush1.bf16.msra.mxu1 %v1572_v47  ;;  %v402_v50 = vpop.f32.mrf.mxu0 }
 0x108   : > { %661 = vmatprep.subr.bf16.mxu1 %v1577_v48  ;;  %v448_v61 = vpack.c.bf16 %v402_v50, %v399_v46 }
 0x109   : > { %v1462_v54 = vpop.f32.mrf.mxu0 }
 0x10a   : > { %1314 = vmatmul.mubr.msk.bf16.gmra.mxu1 %vm526_vm1, %v447_v52 }
 0x10b   : > { %662 = vmatpush1.bf16.msra.mxu1 %v1575_v51  ;;  %v415_v55 = vpop.f32.mrf.mxu0  ;;  %681 = vmatprep.mubr.bf16.mxu1 %v1680_v25  ;;  %v471_v51 = vpop.permute.xlu1 %470 }
 0x10c   : > { %663 = vmatprep.subr.bf16.mxu1 %v1583_v53 }
 0x10d   : > { %v1463_v58 = vpop.f32.mrf.mxu0 }
 0x10e   : > { %v451_v11 = vpack.c.bf16 %v1463_v58, %v1462_v54 }
 0x10f   : > { %664 = vmatpush1.bf16.msra.mxu1 %v1581_v56  ;;  %v418_v59 = vpop.f32.mrf.mxu0 }
 0x110   : > { %773 = vmatprep.subr.bf16.mxu1 %v1586_v57  ;;  %v450_v10 = vpack.c.bf16 %v418_v59, %v415_v55 }
 0x111   : > { %v1466_v63 = vpop.f32.mrf.mxu0 }
 0x112   : > { %1331 = vmatmul.mubr.msk.bf16.vlgmr.msra.gmra.mxu1 %vm526_vm1, %v448_v61 }
 0x113   : > { %774 = vmatpush1.bf16.msra.mxu1 %v1584_v60  ;;  %v431_v0 = vpop.f32.mrf.mxu0  ;;  %691 = vmatprep.mubr.bf16.mxu1 %v1680_v25 }
 0x114   : > { %775 = vmatprep.subr.bf16.mxu1 %v1592_v62 }
 0x115   : > { %v1467_v3 = vpop.f32.mrf.mxu0 }
 0x116   : > { %v453_v12 = vpack.c.bf16 %v1467_v3, %v1466_v63  ;;  %v476_v63 = vpop.permute.xlu1 %475 }
 0x117   : > { %776 = vmatpush1.bf16.msra.mxu1 %v1590_v1  ;;  %v434_v4 = vpop.f32.mrf.mxu0 }
 0x118   : > { %v452_v7 = vpack.c.bf16 %v434_v4, %v431_v0  ;;  %777 = vmatprep.subr.bf16.mxu1 %v1598_v2 }
 0x11a   : > { %1332 = vmatmul.mubr.msk.bf16.gmra.mxu1 %vm526_vm1, %v449_v6  ;;  %1367 = vmatmul.mubr.msk.bf16.vlgmr.msra.gmra.mxu0 %vm526_vm1, %v452_v7 }
 0x11b   : > { %778 = vmatpush1.bf16.msra.mxu1 %v1596_v5  ;;  %797 = vmatprep.mubr.bf16.mxu1 %v1680_v25 }
 0x11c   : > { %779 = vmatprep.subr.bf16.mxu1 %v1601_v8 }
 0x11f   : > { %780 = vmatpush1.bf16.msra.mxu1 %v1599_v9 }
 0x120   : > { %1468 = vmatprep.subr.bf16.mxu1 %v1849_v27 }
 0x122   : > { %1349 = vmatmul.mubr.msk.bf16.vlgmr.msra.gmra.mxu1 %vm526_vm1, %v450_v10 }
 0x123   : > { %1472 = vmatpush1.bf16.msra.mxu1 %v1844_v26  ;;  %807 = vmatprep.mubr.bf16.mxu1 %v1680_v25 }
 0x124   : > { %1469 = vmatprep.subr.bf16.mxu1 %v1862_v29 }
 0x127   : > { %1473 = vmatpush1.bf16.msra.mxu1 %v1857_v28 }
 0x128   : > { %1470 = vmatprep.subr.bf16.mxu1 %v1869_v30 }
 0x12a   : > { %1350 = vmatmul.mubr.msk.bf16.gmra.mxu1 %vm526_vm1, %v451_v11 }
 0x12b   : > { %1474 = vmatpush1.bf16.msra.mxu1 %v1874_v31  ;;  %923 = vmatprep.mubr.bf16.mxu1 %v1680_v25  ;;  %v461_v25 = vpop.permute.xlu0 %460 }
 0x12c   : > { %1471 = vmatprep.subr.bf16.mxu1 %v1881_v32 }
 0x12f   : > { %1475 = vmatpush1.bf16.msra.mxu1 %v1886_v33  ;;  %v466_v31 = vpop.permute.xlu0 %465 }
 0x132   : > { %1368 = vmatmul.mubr.msk.bf16.vlgmr.msra.gmra.mxu1 %vm526_vm1, %v453_v12 }
 0x1c2   : > { %v567_v13 = vpop.f32.mrf.mxu1 }
 0x1c3   : > { %v586_v30 = vadd.f32 %v567_v13, %v461_v25 }
 0x1c4   : > { %v569_v14 = vpop.f32.mrf.mxu1 }
 0x1c5   : > { %v587_v33 = vadd.f32 %v569_v14, %v461_v25 }
 0x1c6   : > { %v571_v15 = vpop.f32.mrf.mxu1 }
 0x1c7   : > { %v588_v37 = vadd.f32 %v571_v15, %v466_v31 }
 0x1c8   : > { %v573_v16 = vpop.f32.mrf.mxu1 }
 0x1c9   : > { %v589_v41 = vadd.f32 %v573_v16, %v466_v31 }
 0x1ca   : > { %v577_v17 = vpop.f32.mrf.mxu1 }
 0x1cb   : > { %v590_v61 = vadd.f32 %v577_v17, %v471_v51 }
 0x1cc   : > { %v1969_v18 = vpop.f32.mrf.mxu1 }
 0x1cd   : > { %v591_v1 = vadd.f32 %v1969_v18, %v471_v51 }
 0x1ce   : > { %v1971_v19 = vpop.f32.mrf.mxu1 }
 0x1cf   : > { %v592_v4 = vadd.f32 %v1971_v19, %v476_v63 }
 0x1d0   : > { %v1973_v20 = vpop.f32.mrf.mxu1 }
 0x1d1   : > { %v593_v8 = vadd.f32 %v1973_v20, %v476_v63 }
 0x1d2   : > { %v683_v21 = vpop.f32.mrf.mxu1 }
 0x1d3   : > { %v702_v34 = vadd.f32 %v683_v21, %v586_v30 }
 0x1d4   : > { %v685_v22 = vpop.f32.mrf.mxu1 }
 0x1d5   : > { %v703_v38 = vadd.f32 %v685_v22, %v587_v33 }
 0x1d6   : > { %v687_v23 = vpop.f32.mrf.mxu1 }
 0x1d7   : > { %v704_v42 = vadd.f32 %v687_v23, %v588_v37 }
 0x1d8   : > { %v689_v24 = vpop.f32.mrf.mxu1 }
 0x1d9   : > { %v705_v47 = vadd.f32 %v689_v24, %v589_v41 }
 0x1da   : > { %v693_v26 = vpop.f32.mrf.mxu1  ;;  %v915_v28 = vpop.f32.mrf.mxu0 }
 0x1db   : > { %v706_v2 = vadd.f32 %v693_v26, %v590_v61 }
 0x1dc   : > { %v695_v27 = vpop.f32.mrf.mxu1  ;;  %v917_v35 = vpop.f32.mrf.mxu0 }
 0x1dd   : > { %v707_v5 = vadd.f32 %v695_v27, %v591_v1 }
 0x1de   : > { %v1975_v29 = vpop.f32.mrf.mxu1  ;;  %v919_v45 = vpop.f32.mrf.mxu0 }
 0x1df   : > { %v708_v9 = vadd.f32 %v1975_v29, %v592_v4 }
 0x1e0   : > { %v1978_v32 = vpop.f32.mrf.mxu1  ;;  %v921_v56 = vpop.f32.mrf.mxu0 }
 0x1e1   : > { %v709_v13 = vadd.f32 %v1978_v32, %v593_v8 }
 0x1e2   : > { %v799_v36 = vpop.f32.mrf.mxu1 }
 0x1e3   : > { %v818_v39 = vadd.f32 %v799_v36, %v702_v34 }
 0x1e4   : > { %v801_v40 = vpop.f32.mrf.mxu1 }
 0x1e5   : > { %v934_v43 = vadd.f32 %v915_v28, %v818_v39  ;;  %v819_v44 = vadd.f32 %v801_v40, %v703_v38 }
 0x1e6   : > { %v803_v46 = vpop.f32.mrf.mxu1 }
 0x1e7   : > { %955 = vst.msk [vmem:[%s1982_s26] sm:$0xf] %vm954_vm2, %v934_v43  ;;  %v1986_v48 = vadd.f32 %v917_v35, %v819_v44  ;;  %v820_v49 = vadd.f32 %v803_v46, %v704_v42  ;;  %963 = vrot.lane.b32.xlu0 %v934_v43, %s1681_s29  ;;  %v946_v50 = vcombine.high %v934_v43, %v934_v43 }
 0x1e8   : > { %v805_v52 = vpop.f32.mrf.mxu1 }
 0x1e9   : > { %1393 = vst.msk [vmem:[%s1982_s26 + $0x10] sm:$0xf] %vm954_vm2, %v1986_v48  ;;  %v1992_v53 = vadd.f32 %v919_v45, %v820_v49  ;;  %v821_v54 = vadd.f32 %v805_v52, %v705_v47  ;;  %965 = vrot.lane.b32.xlu1 %v946_v50, %s1681_s29  ;;  %956 = vst.msk [vmem:[%s1982_s26 + $0x20] sm:$0xf] %vm954_vm2, %v946_v50  ;;  %v1066_v55 = vcombine.high %v1986_v48, %v1986_v48 }
 0x1ea   : > { %v809_v57 = vpop.f32.mrf.mxu1 }
 0x1eb   : > { %957 = vst.msk [vmem:[%s1982_s26 + $0x40] sm:$0xf] %vm954_vm2, %v1992_v53  ;;  %v2002_v58 = vadd.f32 %v921_v56, %v821_v54  ;;  %996 = vrot.lane.b32.xlu0 %v934_v43, %s1682_s30  ;;  %1394 = vst.msk [vmem:[%s1982_s26 + $0x30] sm:$0xf] %vm954_vm2, %v1066_v55  ;;  %v947_v59 = vcombine.high %v1992_v53, %v1992_v53  ;;  %v822_v6 = vadd.f32 %v809_v57, %v706_v2 }
 0x1ec   : > { %v811_v60 = vpop.f32.mrf.mxu1 }
 0x1ed   : > { %1395 = vst.msk [vmem:[%s1982_s26 + $0x50] sm:$0xf] %vm954_vm2, %v2002_v58  ;;  %998 = vrot.lane.b32.xlu1 %v946_v50, %s1682_s30  ;;  %958 = vst.msk [vmem:[%s1982_s26 + $0x60] sm:$0xf] %vm954_vm2, %v947_v59  ;;  %v1067_v62 = vcombine.high %v2002_v58, %v2002_v58  ;;  %v823_v10 = vadd.f32 %v811_v60, %v707_v5 }
 0x1ee   : > { %v813_v0 = vpop.f32.mrf.mxu1 }
 0x1ef   : > { %1029 = vrot.lane.b32.xlu0 %v934_v43, %s1683_s5  ;;  %1396 = vst.msk [vmem:[%s1982_s26 + $0x70] sm:$0xf] %vm954_vm2, %v1067_v62  ;;  %v824_v14 = vadd.f32 %v813_v0, %v708_v9 }
 0x1f0   : > { %v815_v3 = vpop.f32.mrf.mxu1 }
 0x1f1   : > { %1031 = vrot.lane.b32.xlu1 %v946_v50, %s1683_s5  ;;  %v825_v18 = vadd.f32 %v815_v3, %v709_v13 }
 0x1f2   : > { %v925_v7 = vpop.f32.mrf.mxu1 }
 0x1f3   : > { %v938_v11 = vadd.f32 %v925_v7, %v822_v6  ;;  %1083 = vrot.lane.b32.xlu0 %v1986_v48, %s1681_s29 }
 0x1f4   : > { %v927_v12 = vpop.f32.mrf.mxu1 }
 0x1f5   : > { %959 = vst.msk [vmem:[%s1982_s26 + $0x80] sm:$0xf] %vm954_vm2, %v938_v11  ;;  %v939_v15 = vadd.f32 %v927_v12, %v823_v10  ;;  %1085 = vrot.lane.b32.xlu1 %v1066_v55, %s1681_s29  ;;  %v948_v16 = vcombine.high %v938_v11, %v938_v11 }
 0x1f6   : > { %v929_v17 = vpop.f32.mrf.mxu1 }
 0x1f7   : > { %1397 = vst.msk [vmem:[%s1982_s26 + $0x90] sm:$0xf] %vm954_vm2, %v939_v15  ;;  %v940_v19 = vadd.f32 %v929_v17, %v824_v14  ;;  %1116 = vrot.lane.b32.xlu0 %v1986_v48, %s1682_s30  ;;  %960 = vst.msk [vmem:[%s1982_s26 + $0xa0] sm:$0xf] %vm954_vm2, %v948_v16  ;;  %v1068_v20 = vcombine.high %v939_v15, %v939_v15 }
 0x1f8   : > { %v931_v21 = vpop.f32.mrf.mxu1 }
 0x1f9   : > { %961 = vst.msk [vmem:[%s1982_s26 + $0xc0] sm:$0xf] %vm954_vm2, %v940_v19  ;;  %v941_v22 = vadd.f32 %v931_v21, %v825_v18  ;;  %1118 = vrot.lane.b32.xlu1 %v1066_v55, %s1682_s30  ;;  %1398 = vst.msk [vmem:[%s1982_s26 + $0xb0] sm:$0xf] %vm954_vm2, %v1068_v20  ;;  %v949_v23 = vcombine.high %v940_v19, %v940_v19 }
 0x1fb   : > { %1399 = vst.msk [vmem:[%s1982_s26 + $0xd0] sm:$0xf] %vm954_vm2, %v941_v22  ;;  %1149 = vrot.lane.b32.xlu0 %v1986_v48, %s1683_s5  ;;  %962 = vst.msk [vmem:[%s1982_s26 + $0xe0] sm:$0xf] %vm954_vm2, %v949_v23  ;;  %v1069_v24 = vcombine.high %v941_v22, %v941_v22 }
 0x1fd   : > { %1151 = vrot.lane.b32.xlu1 %v1066_v55, %s1683_s5  ;;  %1400 = vst.msk [vmem:[%s1982_s26 + $0xf0] sm:$0xf] %vm954_vm2, %v1069_v24 }
 0x1ff   : > { %967 = vrot.lane.b32.xlu0 %v1992_v53, %s1681_s29 }
 0x201   : > { %969 = vrot.lane.b32.xlu1 %v947_v59, %s1681_s29 }
 0x203   : > { %1000 = vrot.lane.b32.xlu0 %v1992_v53, %s1682_s30 }
 0x205   : > { %1002 = vrot.lane.b32.xlu1 %v947_v59, %s1682_s30 }
 0x207   : > { %1033 = vrot.lane.b32.xlu0 %v1992_v53, %s1683_s5 }
 0x209   : > { %1035 = vrot.lane.b32.xlu1 %v947_v59, %s1683_s5 }
 0x20b   : > { %1087 = vrot.lane.b32.xlu0 %v2002_v58, %s1681_s29 }
 0x20d   : > { %1089 = vrot.lane.b32.xlu1 %v1067_v62, %s1681_s29 }
 0x20f   : > { %1120 = vrot.lane.b32.xlu0 %v2002_v58, %s1682_s30 }
 0x211   : > { %1122 = vrot.lane.b32.xlu1 %v1067_v62, %s1682_s30 }
 0x213   : > { %1153 = vrot.lane.b32.xlu0 %v2002_v58, %s1683_s5 }
 0x215   : > { %1155 = vrot.lane.b32.xlu1 %v1067_v62, %s1683_s5 }
 0x217   : > { %971 = vrot.lane.b32.xlu0 %v938_v11, %s1681_s29 }
 0x219   : > { %973 = vrot.lane.b32.xlu1 %v948_v16, %s1681_s29 }
 0x21b   : > { %1004 = vrot.lane.b32.xlu0 %v938_v11, %s1682_s30 }
 0x21d   : > { %1006 = vrot.lane.b32.xlu1 %v948_v16, %s1682_s30 }
 0x21f   : > { %1037 = vrot.lane.b32.xlu0 %v938_v11, %s1683_s5 }
 0x221   : > { %1039 = vrot.lane.b32.xlu1 %v948_v16, %s1683_s5 }
 0x223   : > { %1091 = vrot.lane.b32.xlu0 %v939_v15, %s1681_s29 }
 0x225   : > { %1093 = vrot.lane.b32.xlu1 %v1068_v20, %s1681_s29 }
 0x227   : > { %1124 = vrot.lane.b32.xlu0 %v939_v15, %s1682_s30 }
 0x229   : > { %1126 = vrot.lane.b32.xlu1 %v1068_v20, %s1682_s30 }
 0x22b   : > { %1157 = vrot.lane.b32.xlu0 %v939_v15, %s1683_s5 }
 0x22d   : > { %1159 = vrot.lane.b32.xlu1 %v1068_v20, %s1683_s5 }
 0x22f   : > { %975 = vrot.lane.b32.xlu0 %v940_v19, %s1681_s29 }
 0x231   : > { %977 = vrot.lane.b32.xlu1 %v949_v23, %s1681_s29 }
 0x233   : > { %1008 = vrot.lane.b32.xlu0 %v940_v19, %s1682_s30 }
 0x235   : > { %1010 = vrot.lane.b32.xlu1 %v949_v23, %s1682_s30 }
 0x237   : > { %1041 = vrot.lane.b32.xlu0 %v940_v19, %s1683_s5 }
 0x239   : > { %1043 = vrot.lane.b32.xlu1 %v949_v23, %s1683_s5 }
 0x23b   : > { %1095 = vrot.lane.b32.xlu0 %v941_v22, %s1681_s29 }
 0x23d   : > { %1097 = vrot.lane.b32.xlu1 %v1069_v24, %s1681_s29 }
 0x23f   : > { %1128 = vrot.lane.b32.xlu0 %v941_v22, %s1682_s30 }
 0x241   : > { %1130 = vrot.lane.b32.xlu1 %v1069_v24, %s1682_s30 }
 0x243   : > { %1161 = vrot.lane.b32.xlu0 %v941_v22, %s1683_s5 }
 0x245   : > { %1163 = vrot.lane.b32.xlu1 %v1069_v24, %s1683_s5 }
 0x259   : > { %v964_v25 = vpop.permute.xlu0 %963 }
 0x25a   : > { %1369 = vst.msk [vmem:[%s1982_s26 + $0x4] sm:$0xf] %vm954_vm2, %v964_v25 }
 0x25b   : > { %v966_v26 = vpop.permute.xlu1 %965 }
 0x25c   : > { %1370 = vst.msk [vmem:[%s1982_s26 + $0x24] sm:$0xf] %vm954_vm2, %v966_v26 }
 0x25d   : > { %v997_v27 = vpop.permute.xlu0 %996 }
 0x25e   : > { %1377 = vst.msk [vmem:[%s1982_s26 + $0x8] sm:$0xf] %vm954_vm2, %v997_v27 }
 0x25f   : > { %v999_v28 = vpop.permute.xlu1 %998 }
 0x260   : > { %1378 = vst.msk [vmem:[%s1982_s26 + $0x28] sm:$0xf] %vm954_vm2, %v999_v28 }
 0x261   : > { %v1030_v29 = vpop.permute.xlu0 %1029 }
 0x262   : > { %1385 = vst.msk [vmem:[%s1982_s26 + $0xc] sm:$0xf] %vm954_vm2, %v1030_v29 }
 0x263   : > { %v1032_v30 = vpop.permute.xlu1 %1031 }
 0x264   : > { %1386 = vst.msk [vmem:[%s1982_s26 + $0x2c] sm:$0xf] %vm954_vm2, %v1032_v30 }
 0x265   : > { %v1084_v31 = vpop.permute.xlu0 %1083 }
 0x266   : > { %1401 = vst.msk [vmem:[%s1982_s26 + $0x14] sm:$0xf] %vm954_vm2, %v1084_v31 }
 0x267   : > { %v1086_v32 = vpop.permute.xlu1 %1085 }
 0x268   : > { %1402 = vst.msk [vmem:[%s1982_s26 + $0x34] sm:$0xf] %vm954_vm2, %v1086_v32 }
 0x269   : > { %v1117_v33 = vpop.permute.xlu0 %1116 }
 0x26a   : > { %1409 = vst.msk [vmem:[%s1982_s26 + $0x18] sm:$0xf] %vm954_vm2, %v1117_v33 }
 0x26b   : > { %v1119_v34 = vpop.permute.xlu1 %1118 }
 0x26c   : > { %1410 = vst.msk [vmem:[%s1982_s26 + $0x38] sm:$0xf] %vm954_vm2, %v1119_v34 }
 0x26d   : > { %v1150_v35 = vpop.permute.xlu0 %1149 }
 0x26e   : > { %1417 = vst.msk [vmem:[%s1982_s26 + $0x1c] sm:$0xf] %vm954_vm2, %v1150_v35 }
 0x26f   : > { %v1152_v36 = vpop.permute.xlu1 %1151 }
 0x270   : > { %1418 = vst.msk [vmem:[%s1982_s26 + $0x3c] sm:$0xf] %vm954_vm2, %v1152_v36 }
 0x271   : > { %v968_v37 = vpop.permute.xlu0 %967 }
 0x272   : > { %1371 = vst.msk [vmem:[%s1982_s26 + $0x44] sm:$0xf] %vm954_vm2, %v968_v37 }
 0x273   : > { %v970_v38 = vpop.permute.xlu1 %969 }
 0x274   : > { %1372 = vst.msk [vmem:[%s1982_s26 + $0x64] sm:$0xf] %vm954_vm2, %v970_v38 }
 0x275   : > { %v1001_v39 = vpop.permute.xlu0 %1000 }
 0x276   : > { %1379 = vst.msk [vmem:[%s1982_s26 + $0x48] sm:$0xf] %vm954_vm2, %v1001_v39 }
 0x277   : > { %v1003_v40 = vpop.permute.xlu1 %1002 }
 0x278   : > { %1380 = vst.msk [vmem:[%s1982_s26 + $0x68] sm:$0xf] %vm954_vm2, %v1003_v40 }
 0x279   : > { %v1034_v41 = vpop.permute.xlu0 %1033 }
 0x27a   : > { %1387 = vst.msk [vmem:[%s1982_s26 + $0x4c] sm:$0xf] %vm954_vm2, %v1034_v41 }
 0x27b   : > { %v1036_v42 = vpop.permute.xlu1 %1035 }
 0x27c   : > { %1388 = vst.msk [vmem:[%s1982_s26 + $0x6c] sm:$0xf] %vm954_vm2, %v1036_v42 }
 0x27d   : > { %v1088_v43 = vpop.permute.xlu0 %1087 }
 0x27e   : > { %1403 = vst.msk [vmem:[%s1982_s26 + $0x54] sm:$0xf] %vm954_vm2, %v1088_v43 }
 0x27f   : > { %v1090_v44 = vpop.permute.xlu1 %1089 }
 0x280   : > { %1404 = vst.msk [vmem:[%s1982_s26 + $0x74] sm:$0xf] %vm954_vm2, %v1090_v44 }
 0x281   : > { %v1121_v45 = vpop.permute.xlu0 %1120 }
 0x282   : > { %1411 = vst.msk [vmem:[%s1982_s26 + $0x58] sm:$0xf] %vm954_vm2, %v1121_v45 }
 0x283   : > { %v1123_v46 = vpop.permute.xlu1 %1122 }
 0x284   : > { %1412 = vst.msk [vmem:[%s1982_s26 + $0x78] sm:$0xf] %vm954_vm2, %v1123_v46 }
 0x285   : > { %v1154_v47 = vpop.permute.xlu0 %1153 }
 0x286   : > { %1419 = vst.msk [vmem:[%s1982_s26 + $0x5c] sm:$0xf] %vm954_vm2, %v1154_v47 }
 0x287   : > { %v1156_v48 = vpop.permute.xlu1 %1155 }
 0x288   : > { %1420 = vst.msk [vmem:[%s1982_s26 + $0x7c] sm:$0xf] %vm954_vm2, %v1156_v48 }
 0x289   : > { %v972_v49 = vpop.permute.xlu0 %971 }
 0x28a   : > { %1373 = vst.msk [vmem:[%s1982_s26 + $0x84] sm:$0xf] %vm954_vm2, %v972_v49 }
 0x28b   : > { %v974_v50 = vpop.permute.xlu1 %973 }
 0x28c   : > { %1374 = vst.msk [vmem:[%s1982_s26 + $0xa4] sm:$0xf] %vm954_vm2, %v974_v50 }
 0x28d   : > { %v1005_v51 = vpop.permute.xlu0 %1004 }
 0x28e   : > { %1381 = vst.msk [vmem:[%s1982_s26 + $0x88] sm:$0xf] %vm954_vm2, %v1005_v51 }
 0x28f   : > { %v1007_v52 = vpop.permute.xlu1 %1006 }
 0x290   : > { %1382 = vst.msk [vmem:[%s1982_s26 + $0xa8] sm:$0xf] %vm954_vm2, %v1007_v52 }
 0x291   : > { %v1038_v53 = vpop.permute.xlu0 %1037 }
 0x292   : > { %1389 = vst.msk [vmem:[%s1982_s26 + $0x8c] sm:$0xf] %vm954_vm2, %v1038_v53 }
 0x293   : > { %v1040_v54 = vpop.permute.xlu1 %1039 }
 0x294   : > { %1390 = vst.msk [vmem:[%s1982_s26 + $0xac] sm:$0xf] %vm954_vm2, %v1040_v54 }
 0x295   : > { %v1092_v55 = vpop.permute.xlu0 %1091 }
 0x296   : > { %1405 = vst.msk [vmem:[%s1982_s26 + $0x94] sm:$0xf] %vm954_vm2, %v1092_v55 }
 0x297   : > { %v1094_v56 = vpop.permute.xlu1 %1093 }
 0x298   : > { %1406 = vst.msk [vmem:[%s1982_s26 + $0xb4] sm:$0xf] %vm954_vm2, %v1094_v56 }
 0x299   : > { %v1125_v57 = vpop.permute.xlu0 %1124 }
 0x29a   : > { %1413 = vst.msk [vmem:[%s1982_s26 + $0x98] sm:$0xf] %vm954_vm2, %v1125_v57 }
 0x29b   : > { %v1127_v58 = vpop.permute.xlu1 %1126 }
 0x29c   : > { %1414 = vst.msk [vmem:[%s1982_s26 + $0xb8] sm:$0xf] %vm954_vm2, %v1127_v58 }
 0x29d   : > { %v1158_v59 = vpop.permute.xlu0 %1157 }
 0x29e   : > { %1421 = vst.msk [vmem:[%s1982_s26 + $0x9c] sm:$0xf] %vm954_vm2, %v1158_v59 }
 0x29f   : > { %v1160_v60 = vpop.permute.xlu1 %1159 }
 0x2a0   : > { %1422 = vst.msk [vmem:[%s1982_s26 + $0xbc] sm:$0xf] %vm954_vm2, %v1160_v60 }
 0x2a1   : > { %v976_v61 = vpop.permute.xlu0 %975 }
 0x2a2   : > { %1375 = vst.msk [vmem:[%s1982_s26 + $0xc4] sm:$0xf] %vm954_vm2, %v976_v61 }
 0x2a3   : > { %v978_v62 = vpop.permute.xlu1 %977 }
 0x2a4   : > { %1376 = vst.msk [vmem:[%s1982_s26 + $0xe4] sm:$0xf] %vm954_vm2, %v978_v62 }
 0x2a5   : > { %v1009_v63 = vpop.permute.xlu0 %1008 }
 0x2a6   : > { %1383 = vst.msk [vmem:[%s1982_s26 + $0xc8] sm:$0xf] %vm954_vm2, %v1009_v63 }
 0x2a7   : > { %v1011_v0 = vpop.permute.xlu1 %1010 }
 0x2a8   : > { %1384 = vst.msk [vmem:[%s1982_s26 + $0xe8] sm:$0xf] %vm954_vm2, %v1011_v0 }
 0x2a9   : > { %v1042_v1 = vpop.permute.xlu0 %1041 }
 0x2aa   : > { %1391 = vst.msk [vmem:[%s1982_s26 + $0xcc] sm:$0xf] %vm954_vm2, %v1042_v1 }
 0x2ab   : > { %v1044_v2 = vpop.permute.xlu1 %1043 }
 0x2ac   : > { %1392 = vst.msk [vmem:[%s1982_s26 + $0xec] sm:$0xf] %vm954_vm2, %v1044_v2 }
 0x2ad   : > { %v1096_v3 = vpop.permute.xlu0 %1095 }
 0x2ae   : > { %1407 = vst.msk [vmem:[%s1982_s26 + $0xd4] sm:$0xf] %vm954_vm2, %v1096_v3 }
 0x2af   : > { %v1098_v4 = vpop.permute.xlu1 %1097 }
 0x2b0   : > { %1408 = vst.msk [vmem:[%s1982_s26 + $0xf4] sm:$0xf] %vm954_vm2, %v1098_v4 }
 0x2b1   : > { %v1129_v5 = vpop.permute.xlu0 %1128 }
 0x2b2   : > { %1415 = vst.msk [vmem:[%s1982_s26 + $0xd8] sm:$0xf] %vm954_vm2, %v1129_v5 }
 0x2b3   : > { %v1131_v6 = vpop.permute.xlu1 %1130 }
 0x2b4   : > { %1416 = vst.msk [vmem:[%s1982_s26 + $0xf8] sm:$0xf] %vm954_vm2, %v1131_v6 }
 0x2b5   : > { %v1162_v7 = vpop.permute.xlu0 %1161 }
 0x2b6   : > { %1423 = vst.msk [vmem:[%s1982_s26 + $0xdc] sm:$0xf] %vm954_vm2, %v1162_v7 }
 0x2b7   : > { %v1164_v8 = vpop.permute.xlu1 %1163 }
 0x2b8   : > { %1424 = vst.msk [vmem:[%s1982_s26 + $0xfc] sm:$0xf] %vm954_vm2, %v1164_v8 }
 0x2b9   : > { %1615 = shalt.err (!%p1612_p5)
}
 0x2ba   : > { %s1616_s21 = scalar_lea.hbm %s2190_s10, 4096  ;;  %s1620_s26 = scalar_lea.hbm %s2251_s4, 8192 }
 0x2bb   : > { %p1617_p6 = scmp.ne.s32.totalorder %s2190_s10, %s1616_s21  ;;  %p1621_p10 = scmp.lt.s32.totalorder %s2190_s10, %s2251_s4 }
 0x2bc   : > { %p1622_p11 = scmp.lt.s32.totalorder %s1620_s26, %s1616_s21 }
 0x2bd   : > { %p1618_p7 = pnand %p1617_p6, %p1751_p4 }
 0x2be   : > { %p1623_p12 = por %p1622_p11, %p1621_p10 }
 0x2bf   : > { %p1619_p9 = pneg %p1618_p7 }
 0x2c1   : > { %p1624_p13 = pnand %p1623_p12, %p1619_p9 }
 0x2c3   : > { %1627 = shalt.err (!%p1624_p13)
}
 0x2c4   : > { %s1685_s6 = smov 4  }
 0x2c5   : > { %1480 = dma.vmem_to_hbm [thread:$0]  (%p1751_p4), %s2194_s7, 4096, %s2190_s10, %s2200_s18, %s1682_s30, %s1682_s30, %s1685_s6  }
 0x2c6 PF: > { %p1486_p0 = scmp.ge.s32.totalorder %s1678_s20, 2  ;;  %s1213_s8 = sand.u32 1, %s1658_s15  }
 0x2c7   : > { %s1214_s9 = scalar_lea.sflag [#allocation3], %s1213_s8 }
 0x2c8   : > { %p1483_p1 = pnand %p1486_p0, %p1758_p8 }
 0x2ca   : > { %p1484_p2 = pneg %p1483_p1 }
 0x2cc   : > { %1653 = dma.done.wait (%p1484_p2), %s1214_s9, 4096  }
 0x2cd   : > { %1655 = vsyncadd (%p1484_p2), %s1214_s9, 4294963200  ;;  %s17_s20 = sadd.s32 1, %s1678_s20   ;;  %s2254_s15 = smov %s1662_s16 }
 0x2ce   : > { %p14_p3 = scmp.ge.s32.totalorder %s17_s20, 4   ;;  %s2255_s16 = smov %s1666_s17 }
 0x2cf   : > { %s2256_s17 = smov %s1764_s28  ;;  %s2257_s18 = smov %s1674_s19 }
 0x2d0   : > { %s2258_s19 = smov %s2260_s23  ;;  %16 = sbr.rel (!%p14_p3) target bundleno = 4 (0x4), region = 81 }
 0x2d5   :  { %1219 = vsyncpa [#allocation3], 1 }
 0x2d6   :  { %1221 = vsyncpa [#allocation3 + $0x1], 1 }

</bundles_post_ra>
